<compile_context>
chip_gen: v5e
topology: v5e:2x2
jax: 0.10.0
libtpu: 0.0.40
codegen_flags: <defaults>
</compile_context>

<pallas_src>
import jax
import jax.numpy as jnp
from jax.experimental import pallas as pl
from jax.experimental.pallas import tpu as pltpu

_LANES = 128
_TILE_ROWS = 2048  # 2048 * 128 * 4 B = 1 MiB per f32 block


def _make_soft_exponential_kernel(alpha: float):
    """Build an alpha-specialized elementwise kernel (single EUP branch)."""
    inv_a = 1.0 / alpha  # hoisted scalar reciprocal (compile-time constant)

    if alpha < 0.0:
        def kernel(x_ref, o_ref):
            x = x_ref[...].astype(jnp.float32)
            y = -jnp.log(1.0 - alpha * (x + alpha)) * inv_a
            o_ref[...] = y.astype(o_ref.dtype)
    else:  # alpha > 0
        def kernel(x_ref, o_ref):
            x = x_ref[...].astype(jnp.float32)
            y = (jnp.exp(alpha * x) - 1.0) * inv_a + alpha
            o_ref[...] = y.astype(o_ref.dtype)

    return kernel


def soft_exponential(x: jax.Array, alpha) -> jax.Array:
    """Apply SoftExponential elementwise to an arbitrary-shaped array."""
    alpha = float(alpha)  # host scalar, same semantics as the PyTorch module
    if alpha == 0.0:
        return x  # identity branch: no kernel launch, no HBM traffic

    orig_shape = x.shape
    n = x.size
    if n == 0:
        return x

    # Lane-dense (rows, 128) view in the *native* dtype. Pad only when the
    # flat size is not a multiple of 128 (rare for real activation tensors).
    xf = x.reshape(-1)
    pad = (-n) % _LANES
    if pad:
        xf = jnp.pad(xf, (0, pad))
    x2d = xf.reshape(-1, _LANES)
    rows = x2d.shape[0]

    # Biggest row-tile that comfortably fits VMEM on v5e/v6e/v7x.
    # If rows < _TILE_ROWS, use the full extent (valid even if rows % 8 != 0).
    block_rows = rows if rows < _TILE_ROWS else _TILE_ROWS
    grid = (pl.cdiv(rows, block_rows),)

    kernel = _make_soft_exponential_kernel(alpha)

    out2d = pl.pallas_call(
        kernel,
        out_shape=jax.ShapeDtypeStruct((rows, _LANES), x.dtype),
        grid=grid,
        in_specs=[pl.BlockSpec((block_rows, _LANES), lambda i: (i, 0))],
        out_specs=pl.BlockSpec((block_rows, _LANES), lambda i: (i, 0)),
        compiler_params=pltpu.CompilerParams(
            dimension_semantics=("parallel",),
        ),
    )(x2d)

    if pad:
        return out2d.reshape(-1)[:n].reshape(orig_shape)
    return out2d.reshape(orig_shape)


def _reference(x, alpha):
    """Pure-JAX reference matching the PyTorch forward."""
    if alpha == 0.0:
        return x
    elif alpha < 0.0:
        return -jnp.log(1.0 - alpha * (x + alpha)) / alpha
    else:
        return (jnp.exp(alpha * x) - 1.0) / alpha + alpha


if __name__ == "__main__":
    key = jax.random.PRNGKey(0)
    # Input consistent with a generic NCHW activation usage; values kept in
    # [-1, 1] so the negative-alpha branch's log argument stays positive.
    x = jax.random.uniform(key, (2, 4, 16, 16), dtype=jnp.float32,
                           minval=-1.0, maxval=1.0)

    ok = True
    for alpha in (0.0, 0.5, -0.5):
        y = soft_exponential(x, alpha)
        jax.block_until_ready(y)
        y_ref = _reference(x, alpha)
        if not jnp.allclose(y, y_ref, atol=1e-5, rtol=1e-5):
            ok = False

    # Ragged flat size (exercises the padded-tail path).
    x_rag = jax.random.uniform(jax.random.PRNGKey(1), (3, 5, 7),
                               dtype=jnp.float32, minval=-1.0, maxval=1.0)
    for alpha in (0.7, -0.3):
        y = soft_exponential(x_rag, alpha)
        jax.block_until_ready(y)
        if not jnp.allclose(y, _reference(x_rag, alpha), atol=1e-5, rtol=1e-5):
            ok = False

    # Native-dtype path: bf16 in, bf16 out (math in f32 inside the kernel).
    x_bf = x.astype(jnp.bfloat16)
    y_bf = soft_exponential(x_bf, 0.5)
    jax.block_until_ready(y_bf)
    if y_bf.dtype != jnp.bfloat16 or not jnp.allclose(
            y_bf.astype(jnp.float32),
            _reference(x_bf.astype(jnp.float32), 0.5),
            atol=3e-2, rtol=3e-2):
        ok = False

    if ok:
        print("KERNEL_OK")
</pallas_src>

<mosaic_0001>
module attributes {stable_mosaic.version = 11 : i64} {
  func.func @kernel(%arg0: i32, %arg1: memref<16x128xf32, #tpu.memory_space<vmem>>, %arg2: memref<16x128xf32, #tpu.memory_space<vmem>>) attributes {dimension_semantics = [#tpu.dimension_semantics<parallel>], iteration_bounds = array<i64: 1>, scalar_prefetch = 0 : i64, scratch_operands = 0 : i64, tpu.core_type = #tpu.core_type<tc>, window_params = [{transform_indices = @transform_0, window_bounds = array<i64: 16, 128>}, {transform_indices = @transform_1, window_bounds = array<i64: 16, 128>}]} {
    %c0 = arith.constant 0 : index
    %c0_0 = arith.constant 0 : index
    %0 = vector.load %arg1[%c0, %c0_0] : memref<16x128xf32, #tpu.memory_space<vmem>>, vector<16x128xf32>
    %cst = arith.constant 5.000000e-01 : f32
    %1 = vector.broadcast %cst : f32 to vector<16x128xf32>
    %2 = arith.mulf %1, %0 : vector<16x128xf32>
    %3 = math.exp %2 : vector<16x128xf32>
    %cst_1 = arith.constant 1.000000e+00 : f32
    %4 = vector.broadcast %cst_1 : f32 to vector<16x128xf32>
    %5 = arith.subf %3, %4 : vector<16x128xf32>
    %cst_2 = arith.constant 2.000000e+00 : f32
    %6 = vector.broadcast %cst_2 : f32 to vector<16x128xf32>
    %7 = arith.mulf %5, %6 : vector<16x128xf32>
    %cst_3 = arith.constant 5.000000e-01 : f32
    %8 = vector.broadcast %cst_3 : f32 to vector<16x128xf32>
    %9 = arith.addf %7, %8 : vector<16x128xf32>
    %c0_4 = arith.constant 0 : index
    %c0_5 = arith.constant 0 : index
    %10 = vector.load %arg2[%c0_4, %c0_5] : memref<16x128xf32, #tpu.memory_space<vmem>>, vector<16x128xf32>
    tpu.vector_store %arg2[%c0_4, %c0_5], %9 {strides = array<i32>} : memref<16x128xf32, #tpu.memory_space<vmem>>, vector<16x128xf32>,
    return
  }
  func.func @transform_0(%arg0: i32) -> (i32, i32) {
    %c0_i32 = arith.constant 0 : i32
    %c0_i32_0 = arith.constant 0 : i32
    return %arg0, %c0_i32 : i32, i32
  }
  func.func @transform_1(%arg0: i32) -> (i32, i32) {
    %c0_i32 = arith.constant 0 : i32
    %c0_i32_0 = arith.constant 0 : i32
    return %arg0, %c0_i32 : i32, i32
  }
}

</mosaic_0001>

<bundles_post_ra>
// kernel: tpu_custom_call.1
= control target key start
LH: loop header
LB: loop body
LE: loop exit
PB: predicated region body
PF: predicated region fallthrough
CT: control target
= control target key end

     0   :  { %6 = vsyncpa [#allocation3], 0  ;;  %s148_s0 = inlined_call_operand.hbm [shape: f32[16,128], index: 0, kind: input, shape index: {}]   ;;  %s149_s1 = inlined_call_operand.hbm [shape: f32[16,128], index: 1, kind: output, shape index: {}]  }
   0x1   :  { %7 = vsyncpa [#allocation4], 0  ;;  %s12_s8 = sshll.u32 %s148_s0, 4  ;;  %s122_s9 = smov [#allocation2]   ;;  %s13_s8 = int_to_ptr.hbm [resolvable:$true] %s12_s8 }
   0x2   :  { %s14_s10 = sshll.u32 %s122_s9, 4  ;;  %s123_s11 = smov 128   ;;  %s15_s10 = int_to_ptr.vmem [resolvable:$true] %s14_s10 }
   0x3   :  { %s124_s12 = smov 8  }
   0x4   :  { %20 = dma.hbm_to_vmem [thread:$0]  %s13_s8, 256, %s15_s10, [#allocation3], %s123_s11, %s123_s11, %s124_s12  }
   0x5   :  { %118 = dma.done.wait [#allocation3], 256  }
   0x6   :  { %119 = vsyncadd [#allocation3], 4294967040  ;;  %v25_v0 = vld [vmem:[#allocation2] sm:$0xff]  ;;  %v26_v1 = vld [vmem:[#allocation2 + $0x8] sm:$0xff]  ;;  %s125_s0 = smov [#allocation5]   ;;  %s47_s16 = sshll.u32 %s149_s1, 4  ;;  %s48_s16 = int_to_ptr.hbm [resolvable:$true] %s47_s16 }
   0x7   :  { %v27_v2 = vmul.f32 0.5, %v25_v0  ;;  %v28_v3 = vmul.f32 0.5, %v26_v1  ;;  %s45_s13 = sshll.u32 %s125_s0, 4  ;;  %s46_s13 = int_to_ptr.vmem [resolvable:$true] %s45_s13 }
   0x9   :  { %v29_v4 = vmul.f32 1.442695, %v27_v2  ;;  %v31_v5 = vmul.f32 1.442695, %v28_v3 }
   0xb   :  { %66 = vpow2.f32 %v29_v4 }
   0xc   :  { %68 = vpow2.f32 %v31_v5 }
  0x11   :  { %v67_v6 = vpop.eup %66 }
  0x12   :  { %v69_v7 = vpop.eup %68  ;;  %v60_v8 = vadd.f32 -1.0, %v67_v6 }
  0x13   :  { %v61_v9 = vadd.f32 -1.0, %v69_v7 }
  0x14   :  { %v35_v10 = vmul.f32 2.0, %v60_v8 }
  0x15   :  { %v36_v11 = vmul.f32 2.0, %v61_v9 }
  0x16   :  { %v37_v12 = vadd.f32 0.5, %v35_v10 }
  0x17   :  { %v38_v13 = vadd.f32 0.5, %v36_v11 }
  0x18   :  { %39 = vst [vmem:[#allocation5] sm:$0xff] %v37_v12 }
  0x19   :  { %40 = vst [vmem:[#allocation5 + $0x8] sm:$0xff] %v38_v13 }
  0x1a   :  { %53 = dma.vmem_to_hbm [thread:$0]  %s46_s13, 256, %s48_s16, [#allocation4], %s123_s11, %s123_s11, %s124_s12  }
  0x1b   :  { %120 = dma.done.wait [#allocation4], 256  }
  0x1c   :  { %121 = vsyncadd [#allocation4], 4294967040 }
  0x1d   :  { %58 = vsyncpa [#allocation3], 1 }
  0x1e   :  { %59 = vsyncpa [#allocation4], 1 }

</bundles_post_ra>
